<compile_context>
chip_gen: v7x
topology: tpu7x:2x2x1
jax: 0.10.0
libtpu: 0.0.40
codegen_flags: <defaults>
</compile_context>

<pallas_src>
import jax
import jax.numpy as jnp
from jax.experimental import pallas as pl
from jax.experimental.pallas import tpu as pltpu


# ---------------------------------------------------------------------------
# Kernel 1: feature transform + left degree scaling
#   xw[i, :] = d[i] * (x[i, :] @ W^T)
# ---------------------------------------------------------------------------
def transform_kernel(x_ref, wt_ref, d_ref, xw_ref):
    xw = jnp.dot(x_ref[...], wt_ref[...], preferred_element_type=jnp.float32)
    xw_ref[...] = (d_ref[...] * xw).astype(xw_ref.dtype)   # bf16, lane-dense store


# ---------------------------------------------------------------------------
# Kernel 2: normalized aggregation (A already includes the +I self-loop) + bias
#   out[i, :] = d[i] * sum_k A[i, k] * xw[k, :] + b
# Grid = (row tiles, k tiles); k is the reduction axis (last, "arbitrary").
# ---------------------------------------------------------------------------
def aggregate_kernel(a_ref, xw_ref, d_ref, b_ref, out_ref, acc_ref):
    k = pl.program_id(1)

    @pl.when(k == 0)
    def _():
        acc_ref[...] = jnp.zeros_like(acc_ref)

    # bf16 x bf16 MXU matmul, f32 accumulation.
    acc_ref[...] += jnp.dot(a_ref[...], xw_ref[...],
                            preferred_element_type=jnp.float32)

    @pl.when(k == pl.num_programs(1) - 1)
    def _():
        out_ref[...] = (d_ref[...] * acc_ref[...] + b_ref[...]).astype(out_ref.dtype)


def _round_up(v, m):
    return pl.cdiv(v, m) * m


# ---------------------------------------------------------------------------
# Wrapper
# ---------------------------------------------------------------------------
def gcn_layer(x, edge_index, weight, bias, *, tile_n=256):
    """x: (N, F_in) f32, edge_index: (2, E) int32,
       weight: (F_out, F_in) f32, bias: (F_out,) f32 -> (N, F_out) f32."""
    n, f_in = x.shape
    f_out = weight.shape[0]

    # Tile sizes: multiples of 128, shrunk for small graphs, padded dims follow.
    tile_n = min(tile_n, _round_up(n, 128))
    n_pad = _round_up(n, tile_n)
    f_out_pad = _round_up(f_out, 128)       # lane-dense output stores

    # ---- plain-JAX glue --------------------------------------------------
    # TODO(synk): for genuinely sparse large graphs, skip the dense N x N
    # adjacency entirely (keep edge_index in SMEM via PrefetchScalarGridSpec
    # and gather/accumulate neighbor rows); dense build kept here to match
    # the reference PyTorch module exactly (duplicate edges are idempotent).
    #
    # A = adj + I built directly in padded bf16 (values {0, 1, 2} exact).
    a_p = jnp.zeros((n_pad, n_pad), jnp.bfloat16)
    a_p = a_p.at[edge_index[0], edge_index[1]].set(jnp.bfloat16(1.0))
    diag = jnp.arange(n)
    a_p = a_p.at[diag, diag].add(jnp.bfloat16(1.0))

    # Column degrees ^ (-1/2), accumulated in f32 (exact for integer degrees).
    deg = jnp.sum(a_p, axis=0, dtype=jnp.float32)           # padded cols -> 0
    valid = jnp.arange(n_pad) < n
    d = jnp.where(valid, jnp.where(valid, deg, 1.0) ** -0.5, 0.0)
    d_p = d.reshape(n_pad, 1)                                # padded rows -> 0

    x_p = jnp.zeros((n_pad, f_in), jnp.float32).at[:n, :].set(x)
    wt_p = jnp.zeros((f_in, f_out_pad), jnp.float32).at[:, :f_out].set(weight.T)
    b_p = jnp.zeros((1, f_out_pad), jnp.float32).at[0, :f_out].set(bias)

    # 32 MiB: <= default scoped VMEM on v6e, comfortable headroom under v7x's
    # 64 MiB physical; the tiles here use ~1 MiB double-buffered.
    vmem_limit = 32 * 1024 * 1024

    # ---- Kernel 1: xw = d * (x @ W^T) ------------------------------------
    xw = pl.pallas_call(
        transform_kernel,
        out_shape=jax.ShapeDtypeStruct((n_pad, f_out_pad), jnp.bfloat16),
        grid=(n_pad // tile_n,),
        in_specs=[
            pl.BlockSpec((tile_n, f_in), lambda i: (i, 0)),
            pl.BlockSpec((f_in, f_out_pad), lambda i: (0, 0)),
            pl.BlockSpec((tile_n, 1), lambda i: (i, 0)),
        ],
        out_specs=pl.BlockSpec((tile_n, f_out_pad), lambda i: (i, 0)),
        compiler_params=pltpu.CompilerParams(
            dimension_semantics=("parallel",),
            vmem_limit_bytes=vmem_limit),
    )(x_p, wt_p, d_p)

    # ---- Kernel 2: out = d * (A @ xw) + b --------------------------------
    out_p = pl.pallas_call(
        aggregate_kernel,
        out_shape=jax.ShapeDtypeStruct((n_pad, f_out_pad), jnp.float32),
        grid=(n_pad // tile_n, n_pad // tile_n),       # (row tiles, reduction tiles)
        in_specs=[
            pl.BlockSpec((tile_n, tile_n), lambda i, k: (i, k)),       # A tile
            pl.BlockSpec((tile_n, f_out_pad), lambda i, k: (k, 0)),    # xw k-tile
            pl.BlockSpec((tile_n, 1), lambda i, k: (i, 0)),            # d row-tile
            pl.BlockSpec((1, f_out_pad), lambda i, k: (0, 0)),         # bias
        ],
        out_specs=pl.BlockSpec((tile_n, f_out_pad), lambda i, k: (i, 0)),
        scratch_shapes=[pltpu.VMEM((tile_n, f_out_pad), jnp.float32)],
        compiler_params=pltpu.CompilerParams(
            dimension_semantics=("parallel", "arbitrary"),
            vmem_limit_bytes=vmem_limit),
    )(a_p, xw, d_p, b_p)

    return out_p[:n, :f_out]


# ---------------------------------------------------------------------------
# Pure-JAX reference (mirrors the PyTorch module literally)
# ---------------------------------------------------------------------------
def gcn_reference(x, edge_index, weight, bias):
    n = x.shape[0]
    adj = jnp.zeros((n, n), jnp.float32).at[edge_index[0], edge_index[1]].set(1.0)
    a = adj + jnp.eye(n, dtype=jnp.float32)
    d = jnp.diag(jnp.sum(a, axis=0) ** -0.5)
    return (d @ a @ d @ x) @ weight.T + bias


if __name__ == "__main__":
    key = jax.random.PRNGKey(0)
    k_x, k_e, k_w, k_b = jax.random.split(key, 4)

    # Small, but large enough to exercise the tiled kernels.
    N, F_IN, F_OUT, E = 256, 64, 32, 1024

    x = jax.random.normal(k_x, (N, F_IN), dtype=jnp.float32)
    edge_index = jax.random.randint(k_e, (2, E), 0, N, dtype=jnp.int32)

    # Deterministic nn.Linear-style init (uniform in +/- 1/sqrt(F_IN)).
    bound = 1.0 / (F_IN ** 0.5)
    weight = jax.random.uniform(k_w, (F_OUT, F_IN), jnp.float32, -bound, bound)
    bias = jax.random.uniform(k_b, (F_OUT,), jnp.float32, -bound, bound)

    out = gcn_layer(x, edge_index, weight, bias)
    out = jax.block_until_ready(out)

    ref = gcn_reference(x, edge_index, weight, bias)
    assert out.shape == (N, F_OUT)
    # bf16 rounding of the xw aggregation operand bounds the error (adjacency
    # values {0,1,2} are exact in bf16; accumulation is f32).
    assert jnp.allclose(out, ref, atol=2e-2, rtol=2e-2), "mismatch vs reference"

    print("KERNEL_OK")
</pallas_src>

<mosaic_0001>
module attributes {stable_mosaic.version = 11 : i64} {
  func.func @transform_kernel(%arg0: i32, %arg1: memref<256x64xf32, #tpu.memory_space<vmem>>, %arg2: memref<64x128xf32, #tpu.memory_space<vmem>>, %arg3: memref<256x1xf32, #tpu.memory_space<vmem>>, %arg4: memref<256x128xbf16, #tpu.memory_space<vmem>>) attributes {dimension_semantics = [#tpu.dimension_semantics<parallel>], iteration_bounds = array<i64: 1>, scalar_prefetch = 0 : i64, scratch_operands = 0 : i64, tpu.core_type = #tpu.core_type<tc>, window_params = [{transform_indices = @transform_0, window_bounds = array<i64: 256, 64>}, {pipeline_mode = #tpu.pipeline_mode<synchronous>, transform_indices = @transform_1, window_bounds = array<i64: 64, 128>}, {transform_indices = @transform_2, window_bounds = array<i64: 256, 1>}, {transform_indices = @transform_3, window_bounds = array<i64: 256, 128>}]} {
    %c0 = arith.constant 0 : index
    %c0_0 = arith.constant 0 : index
    %0 = vector.load %arg1[%c0, %c0_0] : memref<256x64xf32, #tpu.memory_space<vmem>>, vector<256x64xf32>
    %c0_1 = arith.constant 0 : index
    %c0_2 = arith.constant 0 : index
    %1 = vector.load %arg2[%c0_1, %c0_2] : memref<64x128xf32, #tpu.memory_space<vmem>>, vector<64x128xf32>
    %cst = arith.constant dense<0.000000e+00> : vector<256x128xf32>
    %2 = tpu.matmul %0, %1, %cst {dimension_numbers = #tpu.dot_dimension_numbers<[1], [0], [0], [1], [0, 0, 1, 1], [], []>} : vector<256x64xf32>, vector<64x128xf32>, vector<256x128xf32> -> vector<256x128xf32>
    %c0_3 = arith.constant 0 : index
    %c0_4 = arith.constant 0 : index
    %3 = vector.load %arg3[%c0_3, %c0_4] : memref<256x1xf32, #tpu.memory_space<vmem>>, vector<256x1xf32>
    %4 = vector.broadcast %3 : vector<256x1xf32> to vector<256x128xf32>
    %5 = arith.mulf %4, %2 : vector<256x128xf32>
    %6 = arith.truncf %5 : vector<256x128xf32> to vector<256x128xbf16>
    %c0_5 = arith.constant 0 : index
    %c0_6 = arith.constant 0 : index
    %7 = vector.load %arg4[%c0_5, %c0_6] : memref<256x128xbf16, #tpu.memory_space<vmem>>, vector<256x128xbf16>
    tpu.vector_store %arg4[%c0_5, %c0_6], %6 {strides = array<i32>} : memref<256x128xbf16, #tpu.memory_space<vmem>>, vector<256x128xbf16>,
    return
  }
  func.func @transform_0(%arg0: i32) -> (i32, i32) {
    %c0_i32 = arith.constant 0 : i32
    %c0_i32_0 = arith.constant 0 : i32
    return %arg0, %c0_i32 : i32, i32
  }
  func.func @transform_1(%arg0: i32) -> (i32, i32) {
    %c0_i32 = arith.constant 0 : i32
    %c0_i32_0 = arith.constant 0 : i32
    %c0_i32_1 = arith.constant 0 : i32
    return %c0_i32, %c0_i32_0 : i32, i32
  }
  func.func @transform_2(%arg0: i32) -> (i32, i32) {
    %c0_i32 = arith.constant 0 : i32
    %c0_i32_0 = arith.constant 0 : i32
    return %arg0, %c0_i32 : i32, i32
  }
  func.func @transform_3(%arg0: i32) -> (i32, i32) {
    %c0_i32 = arith.constant 0 : i32
    %c0_i32_0 = arith.constant 0 : i32
    return %arg0, %c0_i32 : i32, i32
  }
}

</mosaic_0001>

<bundles_post_ra>
// kernel: tpu_custom_call.1
= control target key start
LH: loop header
LB: loop body
LE: loop exit
PB: predicated region body
PF: predicated region fallthrough
CT: control target
= control target key end

     0   :  { %v1126_v5 = vmov 0   ;;  %vm55_vm0 = vcmask 523264   ;;  %s1437_s0 = inlined_call_operand.vmem [shape: f32[256,64], index: 0, kind: input, shape index: {}]   ;;  %s1438_s1 = inlined_call_operand.vmem [shape: f32[64,128], index: 1, kind: input, shape index: {}]   ;;  %s1439_s2 = inlined_call_operand.vmem [shape: f32[256,1], index: 2, kind: input, shape index: {}]   ;;  %s1440_s3 = inlined_call_operand.hbm [shape: bf16[256,128], index: 3, kind: output, shape index: {}]  }
   0x1   :  { %v47_v0 = vld [vmem:[%s1438_s1] sm:$0xff]  ;;  %v48_v1 = vld [vmem:[%s1438_s1 + $0x8] sm:$0xff]  ;;  %v49_v2 = vld [vmem:[%s1438_s1 + $0x10] sm:$0xff]  ;;  %1101 = vset.pattern.permute.xlu1 %v1126_v5  ;;  %1100 = vset.pattern.permute.xlu0 %v1126_v5 }
   0x2   :  { %v1072_v3 = vpack.c.bf16 %v48_v1, %v47_v0  ;;  %v50_v4 = vld [vmem:[%s1438_s1 + $0x18] sm:$0xff]  ;;  %v51_v7 = vld [vmem:[%s1438_s1 + $0x20] sm:$0xff]  ;;  %v52_v8 = vld [vmem:[%s1438_s1 + $0x28] sm:$0xff] }
   0x3   :  { %v1076_v6 = vpack.c.bf16 %v50_v4, %v49_v2  ;;  %v379_v9 = vld [vmem:[%s1439_s2 + $0x10] sm:$0xff]  ;;  %v377_v10 = vld [vmem:[%s1439_s2] sm:$0xff]  ;;  %v1080_v13 = vpack.c.bf16 %v52_v8, %v51_v7  ;;  %v54_v15 = vld [vmem:[%s1438_s1 + $0x38] sm:$0xff] }
   0x4   :  { %1073 = vmatprep.subr.bf16.mxu0 %v1072_v3  ;;  %1088 = vmatprep.subr.bf16.mxu1 %v1072_v3  ;;  %v15_v11 = vld [vmem:[%s1437_s0] sm:$0xff]  ;;  %v53_v14 = vld [vmem:[%s1438_s1 + $0x30] sm:$0xff]  ;;  %v380_v16 = vld [vmem:[%s1439_s2 + $0x18] sm:$0xff] }
   0x5   :  { %1075 = vmatpush3.bf16.msra.mxu0 %v1072_v3  ;;  %1092 = vmatpush3.bf16.msra.mxu1 %v1072_v3  ;;  %v31_v12 = vld [vmem:[%s1437_s0 + $0x80] sm:$0xff]  ;;  %v378_v17 = vld [vmem:[%s1439_s2 + $0x8] sm:$0xff]  ;;  %v1084_v18 = vpack.c.bf16 %v54_v15, %v53_v14  ;;  %v384_v21 = vld [vmem:[%s1439_s2 + $0x38] sm:$0xff] }
   0x6   :  { %1077 = vmatprep.subr.bf16.mxu0 %v1076_v6  ;;  %1089 = vmatprep.subr.bf16.mxu1 %v1076_v6  ;;  %v382_v19 = vld [vmem:[%s1439_s2 + $0x28] sm:$0xff]  ;;  %v381_v20 = vld [vmem:[%s1439_s2 + $0x20] sm:$0xff]  ;;  %v383_v22 = vld [vmem:[%s1439_s2 + $0x30] sm:$0xff] }
   0x7   :  { %421 = vperm.xlu1 %1101, %v379_v9   ;;  %411 = vperm.xlu0 %1100, %v377_v10   ;;  %v16_v23 = vld [vmem:[%s1437_s0 + $0x8] sm:$0xff]  ;;  %v17_v25 = vld [vmem:[%s1437_s0 + $0x10] sm:$0xff]  ;;  %v385_v28 = vld [vmem:[%s1439_s2 + $0x40] sm:$0xff] }
   0x8   :  { %1024 = vmatprep.mubr.msk.f32.mxu0 %vm55_vm0, %v15_v11  ;;  %1048 = vmatprep.mubr.msk.f32.mxu1 %vm55_vm0, %v31_v12  ;;  %v32_v24 = vld [vmem:[%s1437_s0 + $0x88] sm:$0xff]  ;;  %v33_v26 = vld [vmem:[%s1437_s0 + $0x90] sm:$0xff]  ;;  %v18_v29 = vld [vmem:[%s1437_s0 + $0x18] sm:$0xff] }
   0x9   :  { %1079 = vmatpush3.bf16.msra.mxu0 %v1076_v6  ;;  %1093 = vmatpush3.bf16.msra.mxu1 %v1076_v6  ;;  %v386_v27 = vld [vmem:[%s1439_s2 + $0x48] sm:$0xff]  ;;  %v34_v30 = vld [vmem:[%s1437_s0 + $0x98] sm:$0xff]  ;;  %v19_v31 = vld [vmem:[%s1437_s0 + $0x20] sm:$0xff] }
   0xa   :  { %1081 = vmatprep.subr.bf16.mxu0 %v1080_v13  ;;  %1090 = vmatprep.subr.bf16.mxu1 %v1080_v13  ;;  %v35_v32 = vld [vmem:[%s1437_s0 + $0xa0] sm:$0xff]  ;;  %v388_v33 = vld [vmem:[%s1439_s2 + $0x58] sm:$0xff]  ;;  %v387_v34 = vld [vmem:[%s1439_s2 + $0x50] sm:$0xff] }
   0xb   :  { %426 = vperm.xlu1 %1101, %v380_v16   ;;  %416 = vperm.xlu0 %1100, %v378_v17   ;;  %v20_v35 = vld [vmem:[%s1437_s0 + $0x28] sm:$0xff] }
   0xc   :  { %v36_v36 = vld [vmem:[%s1437_s0 + $0xa8] sm:$0xff] }
   0xd   :  { %1083 = vmatpush3.bf16.msra.mxu0 %v1080_v13  ;;  %1094 = vmatpush3.bf16.msra.mxu1 %v1080_v13 }
   0xe   :  { %1085 = vmatprep.subr.bf16.mxu0 %v1084_v18  ;;  %1091 = vmatprep.subr.bf16.mxu1 %v1084_v18 }
   0xf   :  { %436 = vperm.xlu1 %1101, %v382_v19   ;;  %431 = vperm.xlu0 %1100, %v381_v20  }
  0x11   :  { %1087 = vmatpush3.bf16.msra.mxu0 %v1084_v18  ;;  %1095 = vmatpush3.bf16.msra.mxu1 %v1084_v18 }
  0x13   :  { %446 = vperm.xlu1 %1101, %v384_v21   ;;  %441 = vperm.xlu0 %1100, %v383_v22  }
  0x14   :  { %1025 = vmatmul.mubr.msk.f32.vlgmr.msra.gmra.mrb[0].mxu0 %vm55_vm0, %v16_v23  ;;  %1049 = vmatmul.mubr.msk.f32.vlgmr.msra.gmra.mrb[0].mxu1 %vm55_vm0, %v32_v24 }
  0x15   :  { %1027 = vmatprep.mubr.msk.f32.mxu0 %vm55_vm0, %v17_v25  ;;  %1051 = vmatprep.mubr.msk.f32.mxu1 %vm55_vm0, %v33_v26 }
  0x17   :  { %456 = vperm.xlu1 %1101, %v386_v27   ;;  %451 = vperm.xlu0 %1100, %v385_v28  }
  0x18   :  { %1028 = vmatmul.mubr.msk.f32.gmra.mrb[2].mxu0 %vm55_vm0, %v18_v29  ;;  %1052 = vmatmul.mubr.msk.f32.gmra.mrb[2].mxu1 %vm55_vm0, %v34_v30 }
  0x19   :  { %1030 = vmatprep.mubr.msk.f32.mxu0 %vm55_vm0, %v19_v31  ;;  %1054 = vmatprep.mubr.msk.f32.mxu1 %vm55_vm0, %v35_v32 }
  0x1a   :  { %8 = vsyncpa [#allocation3], 0  ;;  %v21_v37 = vld [vmem:[%s1437_s0 + $0x30] sm:$0xff]  ;;  %v390_v39 = vld [vmem:[%s1439_s2 + $0x68] sm:$0xff] }
  0x1b   :  { %v37_v38 = vld [vmem:[%s1437_s0 + $0xb0] sm:$0xff]  ;;  %466 = vperm.xlu1 %1101, %v388_v33   ;;  %461 = vperm.xlu0 %1100, %v387_v34   ;;  %v389_v40 = vld [vmem:[%s1439_s2 + $0x60] sm:$0xff]  ;;  %v22_v41 = vld [vmem:[%s1437_s0 + $0x38] sm:$0xff] }
  0x1c   :  { %1031 = vmatmul.mubr.msk.f32.gmra.mrb[4].mxu0 %vm55_vm0, %v20_v35  ;;  %1055 = vmatmul.mubr.msk.f32.gmra.mrb[4].mxu1 %vm55_vm0, %v36_v36  ;;  %v38_v42 = vld [vmem:[%s1437_s0 + $0xb8] sm:$0xff]  ;;  %v23_v43 = vld [vmem:[%s1437_s0 + $0x40] sm:$0xff]  ;;  %v391_v46 = vld [vmem:[%s1439_s2 + $0x70] sm:$0xff] }
  0x1d   :  { %1033 = vmatprep.mubr.msk.f32.mxu0 %vm55_vm0, %v21_v37  ;;  %1057 = vmatprep.mubr.msk.f32.mxu1 %vm55_vm0, %v37_v38  ;;  %v39_v44 = vld [vmem:[%s1437_s0 + $0xc0] sm:$0xff]  ;;  %v392_v45 = vld [vmem:[%s1439_s2 + $0x78] sm:$0xff]  ;;  %v24_v47 = vld [vmem:[%s1437_s0 + $0x48] sm:$0xff] }
  0x1e   :  { %v40_v48 = vld [vmem:[%s1437_s0 + $0xc8] sm:$0xff]  ;;  %v25_v49 = vld [vmem:[%s1437_s0 + $0x50] sm:$0xff]  ;;  %v393_v52 = vld [vmem:[%s1439_s2 + $0x80] sm:$0xff] }
  0x1f   :  { %476 = vperm.xlu1 %1101, %v390_v39   ;;  %471 = vperm.xlu0 %1100, %v389_v40   ;;  %v41_v50 = vld [vmem:[%s1437_s0 + $0xd0] sm:$0xff]  ;;  %v394_v51 = vld [vmem:[%s1439_s2 + $0x88] sm:$0xff]  ;;  %v26_v53 = vld [vmem:[%s1437_s0 + $0x58] sm:$0xff] }
  0x20   :  { %1034 = vmatmul.mubr.msk.f32.gmra.mrb[6].mxu0 %vm55_vm0, %v22_v41  ;;  %1058 = vmatmul.mubr.msk.f32.gmra.mrb[6].mxu1 %vm55_vm0, %v38_v42  ;;  %v42_v54 = vld [vmem:[%s1437_s0 + $0xd8] sm:$0xff]  ;;  %v27_v55 = vld [vmem:[%s1437_s0 + $0x60] sm:$0xff]  ;;  %v395_v58 = vld [vmem:[%s1439_s2 + $0x90] sm:$0xff] }
  0x21   :  { %1036 = vmatprep.mubr.msk.f32.mxu0 %vm55_vm0, %v23_v43  ;;  %1060 = vmatprep.mubr.msk.f32.mxu1 %vm55_vm0, %v39_v44  ;;  %v43_v56 = vld [vmem:[%s1437_s0 + $0xe0] sm:$0xff]  ;;  %v396_v57 = vld [vmem:[%s1439_s2 + $0x98] sm:$0xff]  ;;  %v28_v59 = vld [vmem:[%s1437_s0 + $0x68] sm:$0xff] }
  0x22   :  { %v44_v60 = vld [vmem:[%s1437_s0 + $0xe8] sm:$0xff]  ;;  %v29_v61 = vld [vmem:[%s1437_s0 + $0x70] sm:$0xff]  ;;  %v397_v0 = vld [vmem:[%s1439_s2 + $0xa0] sm:$0xff] }
  0x23   :  { %486 = vperm.xlu1 %1101, %v392_v45   ;;  %481 = vperm.xlu0 %1100, %v391_v46   ;;  %v45_v62 = vld [vmem:[%s1437_s0 + $0xf0] sm:$0xff]  ;;  %v398_v63 = vld [vmem:[%s1439_s2 + $0xa8] sm:$0xff]  ;;  %v30_v1 = vld [vmem:[%s1437_s0 + $0x78] sm:$0xff] }
  0x24   :  { %1037 = vmatmul.mubr.msk.f32.gmra.mrb[8].mxu0 %vm55_vm0, %v24_v47  ;;  %1061 = vmatmul.mubr.msk.f32.gmra.mrb[8].mxu1 %vm55_vm0, %v40_v48  ;;  %v46_v2 = vld [vmem:[%s1437_s0 + $0xf8] sm:$0xff]  ;;  %v399_v4 = vld [vmem:[%s1439_s2 + $0xb0] sm:$0xff]  ;;  %v402_v5 = vld [vmem:[%s1439_s2 + $0xc8] sm:$0xff] }
  0x25   :  { %1039 = vmatprep.mubr.msk.f32.mxu0 %vm55_vm0, %v25_v49  ;;  %1063 = vmatprep.mubr.msk.f32.mxu1 %vm55_vm0, %v41_v50  ;;  %v400_v3 = vld [vmem:[%s1439_s2 + $0xb8] sm:$0xff]  ;;  %v401_v6 = vld [vmem:[%s1439_s2 + $0xc0] sm:$0xff]  ;;  %v403_v8 = vld [vmem:[%s1439_s2 + $0xd0] sm:$0xff] }
  0x26   :  { %v404_v7 = vld [vmem:[%s1439_s2 + $0xd8] sm:$0xff]  ;;  %v406_v9 = vld [vmem:[%s1439_s2 + $0xe8] sm:$0xff]  ;;  %v405_v10 = vld [vmem:[%s1439_s2 + $0xe0] sm:$0xff] }
  0x27   :  { %496 = vperm.xlu1 %1101, %v394_v51   ;;  %491 = vperm.xlu0 %1100, %v393_v52   ;;  %v408_v11 = vld [vmem:[%s1439_s2 + $0xf8] sm:$0xff]  ;;  %v407_v12 = vld [vmem:[%s1439_s2 + $0xf0] sm:$0xff]  ;;  %s1127_s2 = smov [#allocation2]  }
  0x28   :  { %1040 = vmatmul.mubr.msk.f32.gmra.mrb[10].mxu0 %vm55_vm0, %v26_v53  ;;  %1064 = vmatmul.mubr.msk.f32.gmra.mrb[10].mxu1 %vm55_vm0, %v42_v54  ;;  %s766_s15 = sshll.u32 %s1127_s2, 4  ;;  %s767_s15 = int_to_ptr.vmem [resolvable:$true] %s766_s15 }
  0x29   :  { %1042 = vmatprep.mubr.msk.f32.mxu0 %vm55_vm0, %v27_v55  ;;  %1066 = vmatprep.mubr.msk.f32.mxu1 %vm55_vm0, %v43_v56  ;;  %s1102_s16 = scalar_lea.vmem %s767_s15, 2048  ;;  %p1107_p1 = scmp.lt.s32.totalorder %s767_s15, %s767_s15 }
  0x2a   :  { %p1103_p0 = scmp.ne.s32.totalorder %s767_s15, %s1102_s16  ;;  %p1108_p2 = scmp.lt.s32.totalorder %s1102_s16, %s1102_s16 }
  0x2b   :  { %506 = vperm.xlu1 %1101, %v396_v57   ;;  %501 = vperm.xlu0 %1100, %v395_v58  }
  0x2c   :  { %1043 = vmatmul.mubr.msk.f32.gmra.mrb[12].mxu0 %vm55_vm0, %v28_v59  ;;  %1067 = vmatmul.mubr.msk.f32.gmra.mrb[12].mxu1 %vm55_vm0, %v44_v60  ;;  %p1109_p3 = por %p1108_p2, %p1107_p1 }
  0x2d   :  { %1045 = vmatprep.mubr.msk.f32.mxu0 %vm55_vm0, %v29_v61  ;;  %1069 = vmatprep.mubr.msk.f32.mxu1 %vm55_vm0, %v45_v62 }
  0x2e   :  { %p1110_p4 = pnand %p1109_p3, %p1103_p0 }
  0x2f   :  { %516 = vperm.xlu1 %1101, %v398_v63   ;;  %511 = vperm.xlu0 %1100, %v397_v0  }
  0x30   :  { %1046 = vmatmul.mubr.msk.f32.gmra.mrb[14].mxu0 %vm55_vm0, %v30_v1  ;;  %1070 = vmatmul.mubr.msk.f32.gmra.mrb[14].mxu1 %vm55_vm0, %v46_v2 }
  0x33   :  { %526 = vperm.xlu1 %1101, %v400_v3   ;;  %521 = vperm.xlu0 %1100, %v399_v4  }
  0x37   :  { %536 = vperm.xlu1 %1101, %v402_v5   ;;  %531 = vperm.xlu0 %1100, %v401_v6  }
  0x3b   :  { %546 = vperm.xlu1 %1101, %v404_v7   ;;  %541 = vperm.xlu0 %1100, %v403_v8  }
  0x3f   :  { %556 = vperm.xlu1 %1101, %v406_v9   ;;  %551 = vperm.xlu0 %1100, %v405_v10  }
  0x43   :  { %566 = vperm.xlu1 %1101, %v408_v11   ;;  %561 = vperm.xlu0 %1100, %v407_v12  }
  0x86   :  { %v422_v13 = vpop.permute.xlu1 %421  ;;  %v412_v14 = vpop.permute.xlu0 %411 }
  0x8a   :  { %v427_v15 = vpop.permute.xlu1 %426  ;;  %v417_v16 = vpop.permute.xlu0 %416 }
  0x8e   :  { %v437_v17 = vpop.permute.xlu1 %436  ;;  %v432_v18 = vpop.permute.xlu0 %431 }
  0x92   :  { %v447_v19 = vpop.permute.xlu1 %446  ;;  %v1398_v20 = vpop.permute.xlu0 %441 }
  0x96   :  { %v1400_v21 = vpop.permute.xlu1 %456  ;;  %v1402_v22 = vpop.permute.xlu0 %451 }
  0x9a   :  { %v1404_v23 = vpop.permute.xlu1 %466  ;;  %v1406_v24 = vpop.permute.xlu0 %461 }
  0x9e   :  { %v1408_v25 = vpop.permute.xlu1 %476  ;;  %v1410_v26 = vpop.permute.xlu0 %471 }
  0xa2   :  { %v1412_v27 = vpop.permute.xlu1 %486  ;;  %v1414_v28 = vpop.permute.xlu0 %481 }
  0xa6   :  { %v497_v29 = vpop.permute.xlu1 %496  ;;  %v492_v30 = vpop.permute.xlu0 %491 }
  0xaa   :  { %v507_v31 = vpop.permute.xlu1 %506  ;;  %v502_v32 = vpop.permute.xlu0 %501 }
  0xae   :  { %v517_v33 = vpop.permute.xlu1 %516  ;;  %v512_v34 = vpop.permute.xlu0 %511 }
  0xb2   :  { %v527_v35 = vpop.permute.xlu1 %526  ;;  %v522_v36 = vpop.permute.xlu0 %521 }
  0xb6   :  { %v537_v45 = vpop.permute.xlu1 %536  ;;  %v532_v46 = vpop.permute.xlu0 %531 }
  0xba   :  { %v547_v3 = vpop.permute.xlu1 %546  ;;  %v542_v4 = vpop.permute.xlu0 %541 }
  0xe7   :  { %v1026_v37 = vpop.f32.mrb[0].mxu0  ;;  %v1050_v38 = vpop.f32.mrb[0].mxu1 }
  0xe8   :  { %v570_v39 = vmul.f32 %v1026_v37, %v417_v16  ;;  %v586_v40 = vmul.f32 %v1050_v38, %v497_v29  ;;  %v218_v41 = vpop.f32.mrb[1].mxu0  ;;  %v298_v42 = vpop.f32.mrb[1].mxu1 }
  0xe9   :  { %v569_v43 = vmul.f32 %v412_v14, %v218_v41  ;;  %v585_v44 = vmul.f32 %v492_v30, %v298_v42 }
  0xeb   :  { %v876_v47 = vpack.c.bf16 %v570_v39, %v569_v43  ;;  %v916_v48 = vpack.c.bf16 %v586_v40, %v585_v44  ;;  %v1029_v49 = vpop.f32.mrb[2].mxu0  ;;  %v1053_v50 = vpop.f32.mrb[2].mxu1 }
  0xec   :  { %v572_v51 = vmul.f32 %v1029_v49, %v427_v15  ;;  %v588_v52 = vmul.f32 %v1053_v50, %v507_v31  ;;  %v228_v53 = vpop.f32.mrb[3].mxu0  ;;  %v308_v54 = vpop.f32.mrb[3].mxu1 }
  0xed   :  { %877 = vst [vmem:[#allocation2] sm:$0xff] %v876_v47   ;;  %960 = vst [vmem:[#allocation2 + $0x40] sm:$0xff] %v916_v48   ;;  %v571_v55 = vmul.f32 %v422_v13, %v228_v53  ;;  %v587_v56 = vmul.f32 %v502_v32, %v308_v54 }
  0xef   :  { %v881_v57 = vpack.c.bf16 %v572_v51, %v571_v55  ;;  %v921_v58 = vpack.c.bf16 %v588_v52, %v587_v56  ;;  %v1032_v59 = vpop.f32.mrb[4].mxu0  ;;  %v1056_v60 = vpop.f32.mrb[4].mxu1 }
  0xf0   :  { %v574_v61 = vmul.f32 %v1032_v59, %v437_v17  ;;  %v590_v62 = vmul.f32 %v1056_v60, %v517_v33  ;;  %v238_v63 = vpop.f32.mrb[5].mxu0  ;;  %v318_v0 = vpop.f32.mrb[5].mxu1 }
  0xf1   :  { %953 = vst [vmem:[#allocation2 + $0x8] sm:$0xff] %v881_v57   ;;  %961 = vst [vmem:[#allocation2 + $0x48] sm:$0xff] %v921_v58   ;;  %v573_v1 = vmul.f32 %v432_v18, %v238_v63  ;;  %v589_v2 = vmul.f32 %v512_v34, %v318_v0  ;;  %v557_v34 = vpop.permute.xlu1 %556 }
  0xf3   :  { %v886_v5 = vpack.c.bf16 %v574_v61, %v573_v1  ;;  %v926_v6 = vpack.c.bf16 %v590_v62, %v589_v2  ;;  %v1035_v7 = vpop.f32.mrb[6].mxu0  ;;  %v1059_v8 = vpop.f32.mrb[6].mxu1 }
  0xf4   :  { %v576_v9 = vmul.f32 %v1035_v7, %v447_v19  ;;  %v592_v10 = vmul.f32 %v1059_v8, %v527_v35  ;;  %v248_v11 = vpop.f32.mrb[7].mxu0  ;;  %v328_v12 = vpop.f32.mrb[7].mxu1 }
  0xf5   :  { %954 = vst [vmem:[#allocation2 + $0x10] sm:$0xff] %v886_v5   ;;  %962 = vst [vmem:[#allocation2 + $0x50] sm:$0xff] %v926_v6   ;;  %v575_v13 = vmul.f32 %v1398_v20, %v248_v11  ;;  %v591_v14 = vmul.f32 %v522_v36, %v328_v12  ;;  %v552_v35 = vpop.permute.xlu0 %551  ;;  %v567_v52 = vpop.permute.xlu1 %566 }
  0xf7   :  { %v891_v15 = vpack.c.bf16 %v576_v9, %v575_v13  ;;  %v931_v16 = vpack.c.bf16 %v592_v10, %v591_v14  ;;  %v1038_v17 = vpop.f32.mrb[8].mxu0  ;;  %v1062_v18 = vpop.f32.mrb[8].mxu1 }
  0xf8   :  { %v578_v29 = vmul.f32 %v1038_v17, %v1400_v21  ;;  %v594_v30 = vmul.f32 %v1062_v18, %v537_v45  ;;  %v258_v31 = vpop.f32.mrb[9].mxu0  ;;  %v338_v32 = vpop.f32.mrb[9].mxu1 }
  0xf9   :  { %955 = vst [vmem:[#allocation2 + $0x18] sm:$0xff] %v891_v15   ;;  %963 = vst [vmem:[#allocation2 + $0x58] sm:$0xff] %v931_v16   ;;  %v577_v19 = vmul.f32 %v1402_v22, %v258_v31  ;;  %v593_v33 = vmul.f32 %v532_v46, %v338_v32  ;;  %v562_v53 = vpop.permute.xlu0 %561 }
  0xfb   :  { %v896_v37 = vpack.c.bf16 %v578_v29, %v577_v19  ;;  %v936_v38 = vpack.c.bf16 %v594_v30, %v593_v33  ;;  %v1041_v20 = vpop.f32.mrb[10].mxu0  ;;  %v1065_v36 = vpop.f32.mrb[10].mxu1 }
  0xfc   :  { %v580_v39 = vmul.f32 %v1041_v20, %v1404_v23  ;;  %v596_v40 = vmul.f32 %v1065_v36, %v547_v3  ;;  %v268_v41 = vpop.f32.mrb[11].mxu0  ;;  %v348_v42 = vpop.f32.mrb[11].mxu1 }
  0xfd   :  { %956 = vst [vmem:[#allocation2 + $0x20] sm:$0xff] %v896_v37   ;;  %964 = vst [vmem:[#allocation2 + $0x60] sm:$0xff] %v936_v38   ;;  %v579_v21 = vmul.f32 %v1406_v24, %v268_v41  ;;  %v595_v43 = vmul.f32 %v542_v4, %v348_v42 }
  0xff   :  { %v901_v44 = vpack.c.bf16 %v580_v39, %v579_v21  ;;  %v941_v45 = vpack.c.bf16 %v596_v40, %v595_v43  ;;  %v1044_v22 = vpop.f32.mrb[12].mxu0  ;;  %v1068_v46 = vpop.f32.mrb[12].mxu1 }
 0x100   :  { %v582_v47 = vmul.f32 %v1044_v22, %v1408_v25  ;;  %v598_v48 = vmul.f32 %v1068_v46, %v557_v34  ;;  %v278_v49 = vpop.f32.mrb[13].mxu0  ;;  %v358_v50 = vpop.f32.mrb[13].mxu1 }
 0x101   :  { %957 = vst [vmem:[#allocation2 + $0x28] sm:$0xff] %v901_v44   ;;  %965 = vst [vmem:[#allocation2 + $0x68] sm:$0xff] %v941_v45   ;;  %v581_v23 = vmul.f32 %v1410_v26, %v278_v49  ;;  %v597_v51 = vmul.f32 %v552_v35, %v358_v50 }
 0x103   :  { %v906_v54 = vpack.c.bf16 %v582_v47, %v581_v23  ;;  %v946_v55 = vpack.c.bf16 %v598_v48, %v597_v51  ;;  %v1047_v24 = vpop.f32.mrb[14].mxu0  ;;  %v1071_v56 = vpop.f32.mrb[14].mxu1 }
 0x104   :  { %v584_v57 = vmul.f32 %v1047_v24, %v1412_v27  ;;  %v600_v58 = vmul.f32 %v1071_v56, %v567_v52  ;;  %v288_v25 = vpop.f32.mrb[15].mxu0  ;;  %v368_v59 = vpop.f32.mrb[15].mxu1 }
 0x105   :  { %958 = vst [vmem:[#allocation2 + $0x30] sm:$0xff] %v906_v54   ;;  %966 = vst [vmem:[#allocation2 + $0x70] sm:$0xff] %v946_v55   ;;  %v583_v60 = vmul.f32 %v1414_v28, %v288_v25  ;;  %v599_v61 = vmul.f32 %v562_v53, %v368_v59 }
 0x107   :  { %v911_v26 = vpack.c.bf16 %v584_v57, %v583_v60  ;;  %v951_v62 = vpack.c.bf16 %v600_v58, %v599_v61 }
 0x109   :  { %959 = vst [vmem:[#allocation2 + $0x38] sm:$0xff] %v911_v26   ;;  %967 = vst [vmem:[#allocation2 + $0x78] sm:$0xff] %v951_v62  }
 0x10a   :  { %1113 = shalt.err (!%p1110_p4)
}
 0x10b   :  { %s1114_s19 = scalar_lea.hbm %s1440_s3, 2048 }
 0x10c   :  { %p1115_p5 = scmp.ne.s32.totalorder %s1440_s3, %s1114_s19  ;;  %p1118_p6 = scmp.lt.u32.totalorder %s1114_s19, %s1440_s3 }
 0x10e   :  { %p1120_p7 = pnand %p1118_p6, %p1115_p5 }
 0x110   :  { %1123 = shalt.err (!%p1120_p7)
}
 0x111   :  { %s1128_s24 = smov 64   ;;  %s1129_s25 = smov 4  }
 0x112   :  { %772 = dma.vmem_to_hbm [thread:$0]  %s767_s15, 2048, %s1440_s3, [#allocation3], %s1128_s24, %s1128_s24, %s1129_s25  }
 0x113   :  { %1124 = dma.done.wait [#allocation3], 2048  }
 0x114   :  { %1125 = vsyncadd [#allocation3], 4294965248 }
 0x115   :  { %776 = vsyncpa [#allocation3], 1 }

</bundles_post_ra>
